<compile_context>
chip_gen: v7x
topology: tpu7x:2x2x1
jax: 0.10.0
libtpu: 0.0.40
codegen_flags: <defaults>
</compile_context>

<pallas_src>
import functools

import jax
import jax.numpy as jnp
from jax.experimental import pallas as pl
from jax.experimental.pallas import tpu as pltpu

_VMEM_LIMIT_BYTES = 48 * 1024 * 1024  # > v5e/v6e scoped defaults, < v7x physical


def _round_up(v, m):
    return ((v + m - 1) // m) * m


def _choose_tile(dim, max_tile, align):
    """Return (tile, padded_dim) with tile <= max_tile, padded_dim % tile == 0."""
    d = _round_up(dim, align)
    if d <= max_tile:
        return d, d
    return max_tile, _round_up(dim, max_tile)


# ----------------------------------------------------------------------------
# Kernel 1: per-node feature transform  XW_l = X @ W_l   (bf16 out, streamed
# into kernel 2's MXU).  Weights resident, big row tiles.
# ----------------------------------------------------------------------------
def _xwl_kernel(x_ref, wl_ref, o_ref):
    o_ref[...] = jnp.dot(
        x_ref[...], wl_ref[...], preferred_element_type=jnp.float32
    ).astype(o_ref.dtype)


# ----------------------------------------------------------------------------
# Kernel 2: aggregation matmul + fused root/bias/ReLU epilogue.
#   o (resident f32 block) += A_tile @ XW_l_ktile
#   at last K step: o = [relu](o + X_rowtile @ W_r + b)
# ----------------------------------------------------------------------------
def _agg_kernel(a_ref, xwl_ref, x_ref, wr_ref, b_ref, o_ref, *, apply_relu):
    k = pl.program_id(1)

    @pl.when(k == 0)
    def _():
        o_ref[...] = jnp.zeros_like(o_ref)

    o_ref[...] += jnp.dot(
        a_ref[...], xwl_ref[...], preferred_element_type=jnp.float32
    )

    @pl.when(k == pl.num_programs(1) - 1)
    def _():
        h = (o_ref[...]
             + jnp.dot(x_ref[...], wr_ref[...], preferred_element_type=jnp.float32)
             + b_ref[...])
        if apply_relu:
            h = jnp.maximum(h, 0.0)
        o_ref[...] = h


def sage_net_forward(x, edge_index, w_l, w_r, b_l, active=True,
                     *, tile_m=256, tile_k=512):
    """SAGE_NET.forward.

    x:          (N, F_in) float32 node features
    edge_index: (2, E) int32, row 0 = source j, row 1 = target i
    w_l, w_r:   (F_in, F_out)  lin_l / lin_r weights (pre-transposed)
    b_l:        (F_out,)       lin_l bias
    """
    assert tile_m % 16 == 0 and tile_k % 128 == 0
    n, f_in = x.shape
    f_out = w_l.shape[1]

    # --- glue (plain JAX): dense row-normalized mean-aggregation matrix ------
    src = edge_index[0]
    dst = edge_index[1]
    counts = jnp.zeros((n, n), dtype=jnp.float32).at[dst, src].add(1.0)
    deg = counts.sum(axis=1, keepdims=True)
    a_mat = jnp.where(deg > 0, counts / jnp.maximum(deg, 1.0), 0.0)

    # --- padding: rows -> sublane multiple (16); lane/contraction dims -> 128 -
    tm, n_row = _choose_tile(n, tile_m, 16)     # output / A rows
    tk, n_col = _choose_tile(n, tile_k, 128)    # neighbor (reduction) dim
    fi_pad = _round_up(f_in, 128)
    fo_pad = _round_up(f_out, 128)
    tm1 = min(512, n_col)                       # kernel-1 row tile (divides n_col)

    a_p = jnp.zeros((n_row, n_col), jnp.bfloat16).at[:n, :n].set(
        a_mat.astype(jnp.bfloat16))
    n_max = max(n_row, n_col)
    x_p = jnp.zeros((n_max, fi_pad), jnp.bfloat16).at[:n, :f_in].set(
        x.astype(jnp.bfloat16))
    x_col = x_p[:n_col]    # rows indexed by neighbor j (kernel 1)
    x_row = x_p[:n_row]    # rows indexed by target i  (kernel 2 epilogue)
    wl_p = jnp.zeros((fi_pad, fo_pad), jnp.bfloat16).at[:f_in, :f_out].set(
        w_l.astype(jnp.bfloat16))
    wr_p = jnp.zeros((fi_pad, fo_pad), jnp.bfloat16).at[:f_in, :f_out].set(
        w_r.astype(jnp.bfloat16))
    b_p = jnp.zeros((1, fo_pad), jnp.float32).at[0, :f_out].set(
        b_l.astype(jnp.float32))

    # --- kernel 1: XW_l = X @ W_l ---------------------------------------------
    xw_cost = pl.CostEstimate(
        flops=2 * n_col * fi_pad * fo_pad,
        transcendentals=0,
        bytes_accessed=(n_col * fi_pad * 2 + fi_pad * fo_pad * 2
                        + n_col * fo_pad * 2),
    )
    xwl = pl.pallas_call(
        _xwl_kernel,
        out_shape=jax.ShapeDtypeStruct((n_col, fo_pad), jnp.bfloat16),
        grid=(n_col // tm1,),
        in_specs=[
            pl.BlockSpec((tm1, fi_pad), lambda i: (i, 0)),
            pl.BlockSpec((fi_pad, fo_pad), lambda i: (0, 0)),   # W_l resident
        ],
        out_specs=pl.BlockSpec((tm1, fo_pad), lambda i: (i, 0)),
        compiler_params=pltpu.CompilerParams(
            dimension_semantics=("parallel",),
            vmem_limit_bytes=_VMEM_LIMIT_BYTES),
        cost_estimate=xw_cost,
    )(x_col, wl_p)

    # --- kernel 2: A @ XW_l  (+ X @ W_r + b, optional ReLU) --------------------
    n_row_tiles = n_row // tm
    agg_cost = pl.CostEstimate(
        flops=2 * n_row * n_col * fo_pad + 2 * n_row * fi_pad * fo_pad,
        transcendentals=0,
        bytes_accessed=(n_row * n_col * 2                       # A (bf16)
                        + n_row_tiles * n_col * fo_pad * 2      # XW_l re-read per row tile
                        + n_row * fi_pad * 2                    # X row tiles
                        + n_row_tiles * fi_pad * fo_pad * 2     # W_r per row tile
                        + fo_pad * 4                            # bias
                        + n_row * fo_pad * 4),                  # output (f32)
    )
    out_p = pl.pallas_call(
        functools.partial(_agg_kernel, apply_relu=bool(active)),
        out_shape=jax.ShapeDtypeStruct((n_row, fo_pad), jnp.float32),
        grid=(n_row // tm, n_col // tk),
        in_specs=[
            pl.BlockSpec((tm, tk), lambda i, k: (i, k)),        # A tiles
            pl.BlockSpec((tk, fo_pad), lambda i, k: (k, 0)),    # XW_l K tiles
            pl.BlockSpec((tm, fi_pad), lambda i, k: (i, 0)),    # X row tile (epilogue)
            pl.BlockSpec((fi_pad, fo_pad), lambda i, k: (0, 0)),  # W_r resident
            pl.BlockSpec((1, fo_pad), lambda i, k: (0, 0)),     # bias resident
        ],
        out_specs=pl.BlockSpec((tm, fo_pad), lambda i, k: (i, 0)),  # resident f32 acc
        compiler_params=pltpu.CompilerParams(
            dimension_semantics=("parallel", "arbitrary"),
            vmem_limit_bytes=_VMEM_LIMIT_BYTES),
        cost_estimate=agg_cost,
    )(a_p, xwl, x_row, wr_p, b_p)

    return out_p[:n, :f_out]


def _reference(x, edge_index, w_l, w_r, b_l, active=True):
    n = x.shape[0]
    src, dst = edge_index[0], edge_index[1]
    counts = jnp.zeros((n, n), dtype=jnp.float32).at[dst, src].add(1.0)
    deg = counts.sum(axis=1, keepdims=True)
    a_mat = jnp.where(deg > 0, counts / jnp.maximum(deg, 1.0), 0.0)
    h = a_mat @ x @ w_l + x @ w_r + b_l.reshape(1, -1)
    return jnp.maximum(h, 0.0) if active else h


def _make_inputs(key, n, f_in, f_out, e):
    k_x, k_wl, k_wr, k_bl, k_e = jax.random.split(key, 5)
    x = jax.random.normal(k_x, (n, f_in), dtype=jnp.float32)
    scale = (6.0 / (f_in + f_out)) ** 0.5
    w_l = jax.random.uniform(k_wl, (f_in, f_out), minval=-scale, maxval=scale)
    w_r = jax.random.uniform(k_wr, (f_in, f_out), minval=-scale, maxval=scale)
    b_l = jax.random.uniform(k_bl, (f_out,), minval=-0.1, maxval=0.1)
    edge_index = jax.random.randint(k_e, (2, e), 0, n, dtype=jnp.int32)
    return x, edge_index, w_l, w_r, b_l


if __name__ == "__main__":
    key = jax.random.PRNGKey(0)
    k1, k2 = jax.random.split(key)

    # --- small config (single-tile path), both active branches ---------------
    x, ei, w_l, w_r, b_l = _make_inputs(k1, n=16, f_in=32, f_out=32, e=48)

    out = jax.block_until_ready(sage_net_forward(x, ei, w_l, w_r, b_l, active=True))
    ref = _reference(x, ei, w_l, w_r, b_l, active=True)
    assert out.shape == (16, 32)
    assert jnp.allclose(out, ref, atol=5e-2, rtol=5e-2)

    out_na = jax.block_until_ready(sage_net_forward(x, ei, w_l, w_r, b_l, active=False))
    ref_na = _reference(x, ei, w_l, w_r, b_l, active=False)
    assert jnp.allclose(out_na, ref_na, atol=5e-2, rtol=5e-2)

    # --- slightly larger config exercising multi row tiles + K accumulation ---
    x2, ei2, w_l2, w_r2, b_l2 = _make_inputs(k2, n=200, f_in=24, f_out=40, e=600)
    out2 = jax.block_until_ready(
        sage_net_forward(x2, ei2, w_l2, w_r2, b_l2, active=True,
                         tile_m=64, tile_k=128))
    ref2 = _reference(x2, ei2, w_l2, w_r2, b_l2, active=True)
    assert out2.shape == (200, 40)
    assert jnp.allclose(out2, ref2, atol=5e-2, rtol=5e-2)

    print("KERNEL_OK")
</pallas_src>

<mosaic_0001>
module attributes {stable_mosaic.version = 11 : i64} {
  func.func @_xwl_kernel(%arg0: i32, %arg1: memref<128x128xbf16, #tpu.memory_space<vmem>>, %arg2: memref<128x128xbf16, #tpu.memory_space<vmem>>, %arg3: memref<128x128xbf16, #tpu.memory_space<vmem>>) attributes {dimension_semantics = [#tpu.dimension_semantics<parallel>], iteration_bounds = array<i64: 1>, scalar_prefetch = 0 : i64, scratch_operands = 0 : i64, tpu.core_type = #tpu.core_type<tc>, window_params = [{transform_indices = @transform_0, window_bounds = array<i64: 128, 128>}, {pipeline_mode = #tpu.pipeline_mode<synchronous>, transform_indices = @transform_1, window_bounds = array<i64: 128, 128>}, {transform_indices = @transform_2, window_bounds = array<i64: 128, 128>}]} {
    %c0 = arith.constant 0 : index
    %c0_0 = arith.constant 0 : index
    %0 = vector.load %arg1[%c0, %c0_0] : memref<128x128xbf16, #tpu.memory_space<vmem>>, vector<128x128xbf16>
    %c0_1 = arith.constant 0 : index
    %c0_2 = arith.constant 0 : index
    %1 = vector.load %arg2[%c0_1, %c0_2] : memref<128x128xbf16, #tpu.memory_space<vmem>>, vector<128x128xbf16>
    %cst = arith.constant dense<0.000000e+00> : vector<128x128xf32>
    %2 = tpu.matmul %0, %1, %cst {dimension_numbers = #tpu.dot_dimension_numbers<[1], [0], [0], [1], [0, 0, 1, 1], [], []>} : vector<128x128xbf16>, vector<128x128xbf16>, vector<128x128xf32> -> vector<128x128xf32>
    %3 = arith.truncf %2 : vector<128x128xf32> to vector<128x128xbf16>
    %c0_3 = arith.constant 0 : index
    %c0_4 = arith.constant 0 : index
    %4 = vector.load %arg3[%c0_3, %c0_4] : memref<128x128xbf16, #tpu.memory_space<vmem>>, vector<128x128xbf16>
    tpu.vector_store %arg3[%c0_3, %c0_4], %3 {strides = array<i32>} : memref<128x128xbf16, #tpu.memory_space<vmem>>, vector<128x128xbf16>,
    return
  }
  func.func @transform_0(%arg0: i32) -> (i32, i32) {
    %c0_i32 = arith.constant 0 : i32
    %c0_i32_0 = arith.constant 0 : i32
    return %arg0, %c0_i32 : i32, i32
  }
  func.func @transform_1(%arg0: i32) -> (i32, i32) {
    %c0_i32 = arith.constant 0 : i32
    %c0_i32_0 = arith.constant 0 : i32
    %c0_i32_1 = arith.constant 0 : i32
    return %c0_i32, %c0_i32_0 : i32, i32
  }
  func.func @transform_2(%arg0: i32) -> (i32, i32) {
    %c0_i32 = arith.constant 0 : i32
    %c0_i32_0 = arith.constant 0 : i32
    return %arg0, %c0_i32 : i32, i32
  }
}

</mosaic_0001>

<bundles_post_ra>
// kernel: tpu_custom_call.1
= control target key start
LH: loop header
LB: loop body
LE: loop exit
PB: predicated region body
PF: predicated region fallthrough
CT: control target
= control target key end

     0   :  { %7 = vsyncpa [#allocation3], 0  ;;  %s681_s0 = inlined_call_operand.hbm [shape: bf16[128,128], index: 0, kind: input, shape index: {}]   ;;  %s682_s1 = inlined_call_operand.hbm [shape: bf16[128,128], index: 1, kind: input, shape index: {}]   ;;  %s683_s2 = inlined_call_operand.hbm [shape: bf16[128,128], index: 2, kind: output, shape index: {}]  }
   0x1   :  { %8 = vsyncpa [#allocation6], 0 }
   0x2   :  { %9 = vsyncpa [#allocation4], 0  ;;  %s616_s9 = smov [#allocation2]   ;;  %s544_s13 = scalar_lea.hbm %s681_s0, 1024 }
   0x3   :  { %s15_s10 = sshll.u32 %s616_s9, 4  ;;  %p545_p0 = scmp.ne.s32.totalorder %s681_s0, %s544_s13  ;;  %s16_s10 = int_to_ptr.vmem [resolvable:$true] %s15_s10 }
   0x4   :  { %p548_p1 = scmp.lt.u32.totalorder %s544_s13, %s681_s0 }
   0x6   :  { %p550_p2 = pnand %p548_p1, %p545_p0 }
   0x8   :  { %553 = shalt.err (!%p550_p2)
}
   0x9   :  { %s554_s18 = scalar_lea.vmem %s16_s10, 1024  ;;  %p559_p4 = scmp.lt.s32.totalorder %s16_s10, %s16_s10 }
   0xa   :  { %p555_p3 = scmp.ne.s32.totalorder %s16_s10, %s554_s18  ;;  %p560_p5 = scmp.lt.s32.totalorder %s554_s18, %s554_s18 }
   0xc   :  { %p561_p6 = por %p560_p5, %p559_p4 }
   0xe   :  { %p562_p7 = pnand %p561_p6, %p555_p3 }
  0x10   :  { %565 = shalt.err (!%p562_p7)
}
  0x11   :  { %s617_s19 = smov 64   ;;  %s618_s20 = smov 4  }
  0x12   :  { %21 = dma.hbm_to_vmem [thread:$0]  %s681_s0, 1024, %s16_s10, [#allocation3], %s617_s19, %s617_s19, %s618_s20  }
  0x13   :  { %s619_s23 = smov [#allocation5]   ;;  %s566_s27 = scalar_lea.hbm %s682_s1, 1024 }
  0x14   :  { %s27_s24 = sshll.u32 %s619_s23, 4  ;;  %p567_p8 = scmp.ne.s32.totalorder %s682_s1, %s566_s27  ;;  %s28_s24 = int_to_ptr.vmem [resolvable:$true] %s27_s24 }
  0x15   :  { %p570_p9 = scmp.lt.u32.totalorder %s566_s27, %s682_s1 }
  0x17   :  { %p572_p10 = pnand %p570_p9, %p567_p8 }
  0x19   :  { %575 = shalt.err (!%p572_p10)
}
  0x1a   :  { %s576_s4 = scalar_lea.vmem %s28_s24, 1024  ;;  %p581_p12 = scmp.lt.s32.totalorder %s28_s24, %s28_s24 }
  0x1b   :  { %p577_p11 = scmp.ne.s32.totalorder %s28_s24, %s576_s4  ;;  %p582_p13 = scmp.lt.s32.totalorder %s576_s4, %s576_s4 }
  0x1d   :  { %p583_p0 = por %p582_p13, %p581_p12 }
  0x1f   :  { %p584_p1 = pnand %p583_p0, %p577_p11 }
  0x21   :  { %587 = shalt.err (!%p584_p1)
}
  0x22   :  { %33 = dma.hbm_to_vmem [thread:$0]  %s682_s1, 1024, %s28_s24, [#allocation6], %s617_s19, %s617_s19, %s618_s20  }
  0x23   :  { %610 = dma.done.wait [#allocation3], 1024  }
  0x24   :  { %611 = vsyncadd [#allocation3], 4294966272 }
  0x25   :  { %612 = dma.done.wait [#allocation6], 1024  }
  0x26   :  { %613 = vsyncadd [#allocation6], 4294966272  ;;  %v528_v0 = vld [vmem:[#allocation5] sm:$0xff]   ;;  %v529_v1 = vld [vmem:[#allocation5 + $0x8] sm:$0xff]   ;;  %s620_s1 = smov [#allocation7]  }
  0x27   :  { %475 = vmatprep.subr.bf16.mxu0 %v528_v0  ;;  %507 = vmatprep.subr.bf16.mxu1 %v528_v0  ;;  %v530_v2 = vld [vmem:[#allocation5 + $0x10] sm:$0xff]   ;;  %v531_v3 = vld [vmem:[#allocation5 + $0x18] sm:$0xff]   ;;  %v536_v4 = vld [vmem:[#allocation2] sm:$0xff]   ;;  %s351_s6 = sshll.u32 %s620_s1, 4  ;;  %s352_s6 = int_to_ptr.vmem [resolvable:$true] %s351_s6 }
  0x28   :  { %476 = vmatpush3.bf16.msra.mxu0 %v528_v0  ;;  %515 = vmatpush3.bf16.msra.mxu1 %v528_v0  ;;  %v537_v5 = vld [vmem:[#allocation2 + $0x20] sm:$0xff]   ;;  %v533_v7 = vld [vmem:[#allocation5 + $0x28] sm:$0xff]   ;;  %v534_v8 = vld [vmem:[#allocation5 + $0x30] sm:$0xff]   ;;  %s588_s7 = scalar_lea.vmem %s352_s6, 1024  ;;  %p593_p3 = scmp.lt.s32.totalorder %s352_s6, %s352_s6 }
  0x29   :  { %477 = vmatprep.subr.bf16.mxu0 %v529_v1  ;;  %508 = vmatprep.subr.bf16.mxu1 %v529_v1  ;;  %v532_v6 = vld [vmem:[#allocation5 + $0x20] sm:$0xff]   ;;  %v535_v9 = vld [vmem:[#allocation5 + $0x38] sm:$0xff]   ;;  %v538_v10 = vld [vmem:[#allocation2 + $0x8] sm:$0xff]   ;;  %p589_p2 = scmp.ne.s32.totalorder %s352_s6, %s588_s7  ;;  %p594_p4 = scmp.lt.s32.totalorder %s588_s7, %s588_s7 }
  0x2a   :  { %491 = vmatprep.mubr.bf16.mxu0 %v536_v4  ;;  %499 = vmatprep.mubr.bf16.mxu1 %v537_v5  ;;  %v539_v11 = vld [vmem:[#allocation2 + $0x28] sm:$0xff]   ;;  %v540_v12 = vld [vmem:[#allocation2 + $0x10] sm:$0xff]   ;;  %v542_v14 = vld [vmem:[#allocation2 + $0x18] sm:$0xff]  }
  0x2b   :  { %v541_v13 = vld [vmem:[#allocation2 + $0x30] sm:$0xff]   ;;  %v543_v15 = vld [vmem:[#allocation2 + $0x38] sm:$0xff]   ;;  %p595_p5 = por %p594_p4, %p593_p3 }
  0x2c   :  { %478 = vmatpush3.bf16.msra.mxu0 %v529_v1  ;;  %516 = vmatpush3.bf16.msra.mxu1 %v529_v1 }
  0x2d   :  { %479 = vmatprep.subr.bf16.mxu0 %v530_v2  ;;  %509 = vmatprep.subr.bf16.mxu1 %v530_v2  ;;  %p596_p6 = pnand %p595_p5, %p589_p2 }
  0x30   :  { %480 = vmatpush3.bf16.msra.mxu0 %v530_v2  ;;  %517 = vmatpush3.bf16.msra.mxu1 %v530_v2 }
  0x31   :  { %481 = vmatprep.subr.bf16.mxu0 %v531_v3  ;;  %510 = vmatprep.subr.bf16.mxu1 %v531_v3 }
  0x34   :  { %482 = vmatpush3.bf16.msra.mxu0 %v531_v3  ;;  %518 = vmatpush3.bf16.msra.mxu1 %v531_v3 }
  0x35   :  { %483 = vmatprep.subr.bf16.mxu0 %v532_v6  ;;  %511 = vmatprep.subr.bf16.mxu1 %v532_v6 }
  0x38   :  { %484 = vmatpush3.bf16.msra.mxu0 %v532_v6  ;;  %519 = vmatpush3.bf16.msra.mxu1 %v532_v6 }
  0x39   :  { %485 = vmatprep.subr.bf16.mxu0 %v533_v7  ;;  %512 = vmatprep.subr.bf16.mxu1 %v533_v7 }
  0x3c   :  { %486 = vmatpush3.bf16.msra.mxu0 %v533_v7  ;;  %520 = vmatpush3.bf16.msra.mxu1 %v533_v7 }
  0x3d   :  { %487 = vmatprep.subr.bf16.mxu0 %v534_v8  ;;  %513 = vmatprep.subr.bf16.mxu1 %v534_v8 }
  0x40   :  { %488 = vmatpush3.bf16.msra.mxu0 %v534_v8  ;;  %521 = vmatpush3.bf16.msra.mxu1 %v534_v8 }
  0x41   :  { %489 = vmatprep.subr.bf16.mxu0 %v535_v9  ;;  %514 = vmatprep.subr.bf16.mxu1 %v535_v9 }
  0x44   :  { %490 = vmatpush3.bf16.msra.mxu0 %v535_v9  ;;  %522 = vmatpush3.bf16.msra.mxu1 %v535_v9 }
  0x47   :  { %492 = vmatmul.mubr.bf16.vlgmr.msra.gmra.mrb[0].mxu0 %v538_v10  ;;  %500 = vmatmul.mubr.bf16.vlgmr.msra.gmra.mrb[0].mxu1 %v539_v11 }
  0x48   :  { %495 = vmatprep.mubr.bf16.mxu0 %v540_v12  ;;  %503 = vmatprep.mubr.bf16.mxu1 %v541_v13 }
  0x4f   :  { %496 = vmatmul.mubr.bf16.gmra.mrb[4].mxu0 %v542_v14  ;;  %504 = vmatmul.mubr.bf16.gmra.mrb[4].mxu1 %v543_v15 }
 0x11a   :  { %v493_v16 = vpop.f32.mrb[0].mxu0  ;;  %v501_v17 = vpop.f32.mrb[0].mxu1 }
 0x11b   :  { %v203_v18 = vpop.f32.mrb[1].mxu0  ;;  %v235_v19 = vpop.f32.mrb[1].mxu1 }
 0x11c   :  { %v494_v20 = vpop.f32.mrb[2].mxu0  ;;  %v502_v21 = vpop.f32.mrb[2].mxu1 }
 0x11d   :  { %v420_v22 = vpack.c.bf16 %v494_v20, %v493_v16  ;;  %v440_v23 = vpack.c.bf16 %v502_v21, %v501_v17  ;;  %v206_v24 = vpop.f32.mrb[3].mxu0  ;;  %v238_v25 = vpop.f32.mrb[3].mxu1 }
 0x11e   :  { %v415_v26 = vpack.c.bf16 %v206_v24, %v203_v18  ;;  %v435_v27 = vpack.c.bf16 %v238_v25, %v235_v19 }
 0x11f   :  { %452 = vst [vmem:[#allocation7 + $0x8] sm:$0xff] %v420_v22   ;;  %456 = vst [vmem:[#allocation7 + $0x28] sm:$0xff] %v440_v23  }
 0x120   :  { %416 = vst [vmem:[#allocation7] sm:$0xff] %v415_v26   ;;  %455 = vst [vmem:[#allocation7 + $0x20] sm:$0xff] %v435_v27  }
 0x122   :  { %v497_v28 = vpop.f32.mrb[4].mxu0  ;;  %v505_v29 = vpop.f32.mrb[4].mxu1 }
 0x123   :  { %v219_v30 = vpop.f32.mrb[5].mxu0  ;;  %v251_v31 = vpop.f32.mrb[5].mxu1 }
 0x124   :  { %v498_v32 = vpop.f32.mrb[6].mxu0  ;;  %v506_v33 = vpop.f32.mrb[6].mxu1 }
 0x125   :  { %v430_v34 = vpack.c.bf16 %v498_v32, %v497_v28  ;;  %v450_v35 = vpack.c.bf16 %v506_v33, %v505_v29  ;;  %v222_v36 = vpop.f32.mrb[7].mxu0  ;;  %v254_v37 = vpop.f32.mrb[7].mxu1 }
 0x126   :  { %v425_v38 = vpack.c.bf16 %v222_v36, %v219_v30  ;;  %v445_v39 = vpack.c.bf16 %v254_v37, %v251_v31 }
 0x127   :  { %454 = vst [vmem:[#allocation7 + $0x18] sm:$0xff] %v430_v34   ;;  %458 = vst [vmem:[#allocation7 + $0x38] sm:$0xff] %v450_v35  }
 0x128   :  { %453 = vst [vmem:[#allocation7 + $0x10] sm:$0xff] %v425_v38   ;;  %457 = vst [vmem:[#allocation7 + $0x30] sm:$0xff] %v445_v39  }
 0x129   :  { %599 = shalt.err (!%p596_p6)
}
 0x12a   :  { %s600_s10 = scalar_lea.hbm %s683_s2, 1024 }
 0x12b   :  { %p601_p7 = scmp.ne.s32.totalorder %s683_s2, %s600_s10  ;;  %p604_p8 = scmp.lt.u32.totalorder %s600_s10, %s683_s2 }
 0x12d   :  { %p606_p9 = pnand %p604_p8, %p601_p7 }
 0x12f   :  { %609 = shalt.err (!%p606_p9)
}
 0x130   :  { %357 = dma.vmem_to_hbm [thread:$0]  %s352_s6, 1024, %s683_s2, [#allocation4], %s617_s19, %s617_s19, %s618_s20  }
 0x131   :  { %614 = dma.done.wait [#allocation4], 1024  }
 0x132   :  { %615 = vsyncadd [#allocation4], 4294966272 }
 0x133   :  { %361 = vsyncpa [#allocation3], 1 }
 0x134   :  { %362 = vsyncpa [#allocation6], 1 }
 0x135   :  { %363 = vsyncpa [#allocation4], 1 }

</bundles_post_ra>
